<compile_context>
chip_gen: v6e
topology: v6e:2x2x1
jax: 0.10.0
libtpu: 0.0.40
codegen_flags: <defaults>
</compile_context>

<pallas_src>
import functools
import math

import jax
import jax.numpy as jnp
from jax.experimental import pallas as pl
from jax.experimental.pallas import tpu as pltpu


def _round_up(x, m):
    return ((x + m - 1) // m) * m


def _vmem_budget_bytes():
    """Generation-aware VMEM cap (leave headroom for compiler scratch)."""
    try:
        cap = pltpu.get_tpu_info().vmem_capacity_bytes
    except Exception:
        cap = 64 * 1024 * 1024  # conservative: v7x has 64 MiB per TensorCore
    # v7x (64 MiB) -> 48 MiB; v5e/v6e (128 MiB) -> 96 MiB.
    return min(int(cap * 3 // 4), 96 * 1024 * 1024)


def _select_tiles(m_hint, n_pad128, k_pad128, in_itemsize, out_itemsize, has_bias):
    """Pick (tm, tn, tk).  Prefer big tiles; shrink only if over VMEM budget."""
    budget = _vmem_budget_bytes()
    tm = min(512, _round_up(max(m_hint, 1), 8))
    tn = min(1024, n_pad128)
    tk = min(1024, k_pad128)

    def usage(tm_, tn_, tk_):
        u = 2 * (tm_ * tk_ + tk_ * tn_) * in_itemsize + 2 * tm_ * tn_ * out_itemsize
        if has_bias:
            u += 2 * tn_ * 4
        if out_itemsize != 4:
            u += tm_ * tn_ * 4  # f32 accumulator scratch
        return u

    def shrink(v, align):
        return max(align, ((v // 2) // align) * align)

    # Defensive only: preferred tiles already fit well under the v7x budget.
    while usage(tm, tn, tk) > (2 * budget) // 3:
        if tk > 256:
            tk = shrink(tk, 128)
        elif tn > 256:
            tn = shrink(tn, 128)
        elif tm > 256:
            tm = shrink(tm, 8)
        elif tk > 128:
            tk = shrink(tk, 128)
        elif tn > 128:
            tn = shrink(tn, 128)
        elif tm > 8:
            tm = shrink(tm, 8)
        else:
            break
    return tm, tn, tk


def _prepare_weight(weight, bias, tn, tk, compute_dtype):
    """One-time weight-side glue: optional bf16 cast, transpose to (K, N), pad."""
    N, K = weight.shape
    n_pad = _round_up(_round_up(N, 128), tn)
    k_pad = _round_up(_round_up(K, 128), tk)
    w = weight.astype(compute_dtype) if compute_dtype is not None else weight
    w_t = w.T  # (K, N): kernel does a plain jnp.dot, no per-tile RHS transpose
    if (k_pad, n_pad) != (K, N):
        w_t = jnp.pad(w_t, ((0, k_pad - K), (0, n_pad - N)))
    b2d = None
    if bias is not None:
        b2d = bias.reshape(1, N)
        if n_pad != N:
            b2d = jnp.pad(b2d, ((0, 0), (0, n_pad - N)))
    return w_t, b2d


def _make_ff_kernel(activ, has_bias, use_acc_scratch):
    """Kernel body for a given (activation, bias, scratch) configuration."""

    def kernel(*refs):
        idx = 0
        x_ref = refs[idx]; idx += 1          # (tm, tk)
        w_ref = refs[idx]; idx += 1          # (tk, tn)  -- pre-transposed (K, N)
        b_ref = None
        if has_bias:
            b_ref = refs[idx]; idx += 1      # (1, tn)
        o_ref = refs[idx]; idx += 1          # (tm, tn)
        acc_ref = refs[idx] if use_acc_scratch else o_ref

        # NOTE: accumulating into acc_ref/o_ref across K is only valid because
        # K is the INNERMOST grid axis and the output index_map (i, j) does not
        # depend on k.  Do not reorder the grid without revisiting this.
        k = pl.program_id(2)

        part = jnp.dot(x_ref[...], w_ref[...], preferred_element_type=jnp.float32)

        @pl.when(k == 0)
        def _():
            acc_ref[...] = part              # direct write; no zero-init pass

        @pl.when(k != 0)
        def _():
            acc_ref[...] += part

        @pl.when(k == pl.num_programs(2) - 1)
        def _():
            out = acc_ref[...]
            if has_bias:
                out = out + b_ref[...]       # (1, tn) broadcasts over tm rows
            if activ == "tanh":
                out = jnp.tanh(out)
            elif activ == "relu":
                out = jnp.maximum(out, 0.0)
            elif activ == "sigmoid":
                out = jax.nn.sigmoid(out)
            # activ is None -> identity
            o_ref[...] = out.astype(o_ref.dtype)

    return kernel


def _ff_apply(x, w_t_pad, b2d_pad, N, activ, compute_dtype, tm_pref, tn, tk):
    """Hot path: pad x, run the pallas matmul, slice the result back."""
    orig_shape = x.shape
    K = orig_shape[-1]
    x2d = x.reshape(-1, K)
    M = x2d.shape[0]
    out_dtype = x.dtype
    k_pad, n_pad = w_t_pad.shape
    assert K <= k_pad and N <= n_pad, "prepared weight does not match x"

    if compute_dtype is not None:
        x2d = x2d.astype(compute_dtype)

    m_pad = _round_up(M, 8)
    tm = min(tm_pref, m_pad)
    m_pad = _round_up(m_pad, tm)

    if (m_pad, k_pad) != (M, K):
        # Zero K-padding keeps the accumulator exact; padded M rows are sliced off.
        x2d = jnp.pad(x2d, ((0, m_pad - M), (0, k_pad - K)))

    has_bias = b2d_pad is not None
    use_acc_scratch = jnp.dtype(out_dtype) != jnp.dtype(jnp.float32)

    # j (N tiles) leads the grid so megacore shards the weight across cores.
    grid = (n_pad // tn, m_pad // tm, k_pad // tk)

    in_specs = [
        pl.BlockSpec((tm, tk), lambda j, i, k: (i, k)),   # x tile
        pl.BlockSpec((tk, tn), lambda j, i, k: (k, j)),   # weight tile (K, N)
    ]
    args = [x2d, w_t_pad]
    if has_bias:
        in_specs.append(pl.BlockSpec((1, tn), lambda j, i, k: (0, j)))
        args.append(b2d_pad)

    scratch_shapes = [pltpu.VMEM((tm, tn), jnp.float32)] if use_acc_scratch else []

    in_itemsize = jnp.dtype(x2d.dtype).itemsize
    out_itemsize = jnp.dtype(out_dtype).itemsize
    vmem_bytes = 2 * (tm * tk + tk * tn) * in_itemsize + 2 * tm * tn * out_itemsize
    if has_bias:
        vmem_bytes += 2 * tn * jnp.dtype(b2d_pad.dtype).itemsize
    if use_acc_scratch:
        vmem_bytes += tm * tn * 4
    budget = _vmem_budget_bytes()
    vmem_limit = int(min(max(vmem_bytes + vmem_bytes // 2, 32 * 1024 * 1024), budget))

    flops = 2 * M * N * K
    bytes_accessed = (M * K * in_itemsize + K * N * in_itemsize
                      + (N * 4 if has_bias else 0) + M * N * out_itemsize)
    transcendentals = M * N if activ in ("tanh", "sigmoid") else 0

    kernel = _make_ff_kernel(activ, has_bias, use_acc_scratch)

    out2d = pl.pallas_call(
        kernel,
        out_shape=jax.ShapeDtypeStruct((m_pad, n_pad), out_dtype),
        grid_spec=pltpu.PrefetchScalarGridSpec(
            num_scalar_prefetch=0,
            grid=grid,
            in_specs=in_specs,
            out_specs=pl.BlockSpec((tm, tn), lambda j, i, k: (i, j)),
            scratch_shapes=scratch_shapes,
        ),
        compiler_params=pltpu.CompilerParams(
            dimension_semantics=("parallel", "parallel", "arbitrary"),
            vmem_limit_bytes=vmem_limit,
        ),
        cost_estimate=pl.CostEstimate(
            flops=flops,
            transcendentals=transcendentals,
            bytes_accessed=bytes_accessed,
        ),
    )(*args)

    out2d = out2d[:M, :N]
    return out2d.reshape(orig_shape[:-1] + (N,))


@functools.partial(jax.jit, static_argnames=("activ", "compute_dtype"))
def ff_forward(x, weight, bias=None, *, activ=None, compute_dtype=None):
    """Pallas equivalent of FF.forward (F.linear + optional activation).

    x:      (..., in_features)
    weight: (out_features, in_features)   (PyTorch layout; transposed in-wrapper)
    bias:   (out_features,) or None
    activ:  None | "tanh" | "relu" | "sigmoid"
    compute_dtype: opt-in jnp.bfloat16 for the bf16 MXU path (f32 accumulation
                   kept).  Default None = exact f32 module semantics.
    """
    N, K = weight.shape
    assert x.shape[-1] == K, "in_features mismatch"
    M = 1
    for d in x.shape[:-1]:
        M *= d
    in_dtype = compute_dtype if compute_dtype is not None else x.dtype
    tm, tn, tk = _select_tiles(M, _round_up(N, 128), _round_up(K, 128),
                               jnp.dtype(in_dtype).itemsize,
                               jnp.dtype(x.dtype).itemsize,
                               bias is not None)
    w_t, b2d = _prepare_weight(weight, bias, tn, tk, compute_dtype)
    return _ff_apply(x, w_t, b2d, N, activ, compute_dtype, tm, tn, tk)


def make_ff(weight, bias=None, *, activ=None, compute_dtype=None):
    """Cache the weight-side preprocessing (transpose/pad/cast) once and return
    a jitted forward function of x only.  Use when the layer is applied many
    times: the per-call glue is reduced to x padding + the kernel."""
    N, K = weight.shape
    in_dtype = compute_dtype if compute_dtype is not None else weight.dtype
    tm_pref, tn, tk = _select_tiles(512, _round_up(N, 128), _round_up(K, 128),
                                    jnp.dtype(in_dtype).itemsize,
                                    jnp.dtype(weight.dtype).itemsize,
                                    bias is not None)
    w_t, b2d = _prepare_weight(weight, bias, tn, tk, compute_dtype)
    w_t = jax.block_until_ready(w_t)
    if b2d is not None:
        b2d = jax.block_until_ready(b2d)

    @jax.jit
    def fwd(x):
        return _ff_apply(x, w_t, b2d, N, activ, compute_dtype, tm_pref, tn, tk)

    return fwd


def init_ff_params(key, in_features, out_features, bias=True, bias_zero=True):
    """Deterministic init mirroring FF.reset_parameters."""
    stdv = 1.0 / math.sqrt(in_features)
    kw, kb = jax.random.split(key)
    weight = jax.random.uniform(
        kw, (out_features, in_features), jnp.float32, minval=-stdv, maxval=stdv
    )
    if not bias:
        return weight, None
    if bias_zero:
        b = jnp.zeros((out_features,), jnp.float32)
    else:
        b = jax.random.uniform(
            kb, (out_features,), jnp.float32, minval=-stdv, maxval=stdv
        )
    return weight, b


if __name__ == "__main__":
    key = jax.random.PRNGKey(0)
    k_x, k_p, k_x2, k_p2, k_x3, k_p3 = jax.random.split(key, 6)

    # --- Test 1: small module-spec shapes (batch=2, seq=8, hidden=32), bias + tanh. ---
    B, S, in_features, out_features = 2, 8, 32, 64
    x = jax.random.normal(k_x, (B, S, in_features), jnp.float32)
    weight, bias = init_ff_params(k_p, in_features, out_features,
                                  bias=True, bias_zero=True)
    out = ff_forward(x, weight, bias, activ="tanh")
    out = jax.block_until_ready(out)
    ref = jnp.tanh(x @ weight.T + bias)
    assert out.shape == (B, S, out_features)
    assert jnp.allclose(out, ref, atol=1e-5, rtol=1e-5), "mismatch vs reference (test 1)"

    # --- Test 2: ragged dims, no bias, relu (exercises padding + tiling paths). ---
    M2, in2, out2 = 300, 200, 260
    x2 = jax.random.normal(k_x2, (M2, in2), jnp.float32)
    w2, b2 = init_ff_params(k_p2, in2, out2, bias=False)
    y2 = ff_forward(x2, w2, b2, activ="relu")
    y2 = jax.block_until_ready(y2)
    ref2 = jnp.maximum(x2 @ w2.T, 0.0)
    assert y2.shape == (M2, out2)
    assert jnp.allclose(y2, ref2, atol=1e-4, rtol=1e-4), "mismatch vs reference (test 2)"

    # --- Test 3: cached-weight path (make_ff) with bf16 compute, bias + sigmoid. ---
    M3, in3, out3 = 64, 256, 384
    x3 = jax.random.normal(k_x3, (M3, in3), jnp.float32)
    w3, b3 = init_ff_params(k_p3, in3, out3, bias=True, bias_zero=False)
    ff3 = make_ff(w3, b3, activ="sigmoid", compute_dtype=jnp.bfloat16)
    y3 = jax.block_until_ready(ff3(x3))
    ref3 = jax.nn.sigmoid(x3 @ w3.T + b3)
    assert y3.shape == (M3, out3)
    assert jnp.allclose(y3, ref3, atol=2e-2, rtol=2e-2), "mismatch vs reference (test 3)"

    print("KERNEL_OK")
</pallas_src>

<mosaic_0001>
module attributes {stable_mosaic.version = 11 : i64} {
  func.func @kernel(%arg0: i32, %arg1: i32, %arg2: i32, %arg3: memref<16x128xf32, #tpu.memory_space<vmem>>, %arg4: memref<128x128xf32, #tpu.memory_space<vmem>>, %arg5: memref<1x128xf32, #tpu.memory_space<vmem>>, %arg6: memref<16x128xf32, #tpu.memory_space<vmem>>) attributes {dimension_semantics = [#tpu.dimension_semantics<parallel>, #tpu.dimension_semantics<parallel>, #tpu.dimension_semantics<arbitrary>], iteration_bounds = array<i64: 1, 1, 1>, scalar_prefetch = 0 : i64, scratch_operands = 0 : i64, tpu.core_type = #tpu.core_type<tc>, window_params = [{transform_indices = @transform_0, window_bounds = array<i64: 16, 128>}, {transform_indices = @transform_1, window_bounds = array<i64: 128, 128>}, {transform_indices = @transform_2, window_bounds = array<i64: 1, 128>}, {transform_indices = @transform_3, window_bounds = array<i64: 16, 128>}]} {
    %c0 = arith.constant 0 : index
    %c0_0 = arith.constant 0 : index
    %0 = vector.load %arg3[%c0, %c0_0] : memref<16x128xf32, #tpu.memory_space<vmem>>, vector<16x128xf32>
    %c0_1 = arith.constant 0 : index
    %c0_2 = arith.constant 0 : index
    %1 = vector.load %arg4[%c0_1, %c0_2] : memref<128x128xf32, #tpu.memory_space<vmem>>, vector<128x128xf32>
    %cst = arith.constant dense<0.000000e+00> : vector<16x128xf32>
    %2 = tpu.matmul %0, %1, %cst {dimension_numbers = #tpu.dot_dimension_numbers<[1], [0], [0], [1], [0, 0, 1, 1], [], []>} : vector<16x128xf32>, vector<128x128xf32>, vector<16x128xf32> -> vector<16x128xf32>
    %c0_i32 = arith.constant 0 : i32
    %3 = arith.cmpi eq, %arg2, %c0_i32 : i32
    %4 = arith.extui %3 : i1 to i32
    %c0_i32_3 = arith.constant 0 : i32
    %5 = arith.cmpi ne, %4, %c0_i32_3 : i32
    scf.if %5 {
      %c0_8 = arith.constant 0 : index
      %c0_9 = arith.constant 0 : index
      %12 = vector.load %arg6[%c0_8, %c0_9] : memref<16x128xf32, #tpu.memory_space<vmem>>, vector<16x128xf32>
      tpu.vector_store %arg6[%c0_8, %c0_9], %2 {strides = array<i32>} : memref<16x128xf32, #tpu.memory_space<vmem>>, vector<16x128xf32>,
    } else {
    }
    %c0_i32_4 = arith.constant 0 : i32
    %6 = arith.cmpi ne, %arg2, %c0_i32_4 : i32
    %7 = arith.extui %6 : i1 to i32
    %c0_i32_5 = arith.constant 0 : i32
    %8 = arith.cmpi ne, %7, %c0_i32_5 : i32
    scf.if %8 {
      %c0_8 = arith.constant 0 : index
      %c0_9 = arith.constant 0 : index
      %12 = vector.load %arg6[%c0_8, %c0_9] : memref<16x128xf32, #tpu.memory_space<vmem>>, vector<16x128xf32>
      %13 = arith.addf %12, %2 : vector<16x128xf32>
      %c0_10 = arith.constant 0 : index
      %c0_11 = arith.constant 0 : index
      %14 = vector.load %arg6[%c0_10, %c0_11] : memref<16x128xf32, #tpu.memory_space<vmem>>, vector<16x128xf32>
      tpu.vector_store %arg6[%c0_10, %c0_11], %13 {strides = array<i32>} : memref<16x128xf32, #tpu.memory_space<vmem>>, vector<16x128xf32>,
    } else {
    }
    %c0_i32_6 = arith.constant 0 : i32
    %9 = arith.cmpi eq, %arg2, %c0_i32_6 : i32
    %10 = arith.extui %9 : i1 to i32
    %c0_i32_7 = arith.constant 0 : i32
    %11 = arith.cmpi ne, %10, %c0_i32_7 : i32
    scf.if %11 {
      %c0_8 = arith.constant 0 : index
      %c0_9 = arith.constant 0 : index
      %12 = vector.load %arg6[%c0_8, %c0_9] : memref<16x128xf32, #tpu.memory_space<vmem>>, vector<16x128xf32>
      %c0_10 = arith.constant 0 : index
      %c0_11 = arith.constant 0 : index
      %13 = vector.load %arg5[%c0_10, %c0_11] : memref<1x128xf32, #tpu.memory_space<vmem>>, vector<1x128xf32>
      %14 = vector.broadcast %13 : vector<1x128xf32> to vector<16x128xf32>
      %15 = arith.addf %12, %14 : vector<16x128xf32>
      %16 = math.tanh %15 : vector<16x128xf32>
      %c0_12 = arith.constant 0 : index
      %c0_13 = arith.constant 0 : index
      %17 = vector.load %arg6[%c0_12, %c0_13] : memref<16x128xf32, #tpu.memory_space<vmem>>, vector<16x128xf32>
      tpu.vector_store %arg6[%c0_12, %c0_13], %16 {strides = array<i32>} : memref<16x128xf32, #tpu.memory_space<vmem>>, vector<16x128xf32>,
    } else {
    }
    return
  }
  func.func @transform_0(%arg0: i32, %arg1: i32, %arg2: i32) -> (i32, i32) {
    %c0_i32 = arith.constant 0 : i32
    return %arg1, %arg2 : i32, i32
  }
  func.func @transform_1(%arg0: i32, %arg1: i32, %arg2: i32) -> (i32, i32) {
    %c0_i32 = arith.constant 0 : i32
    return %arg2, %arg0 : i32, i32
  }
  func.func @transform_2(%arg0: i32, %arg1: i32, %arg2: i32) -> (i32, i32) {
    %c0_i32 = arith.constant 0 : i32
    %c0_i32_0 = arith.constant 0 : i32
    return %c0_i32, %arg0 : i32, i32
  }
  func.func @transform_3(%arg0: i32, %arg1: i32, %arg2: i32) -> (i32, i32) {
    %c0_i32 = arith.constant 0 : i32
    return %arg1, %arg0 : i32, i32
  }
}

</mosaic_0001>

<bundles_post_ra>
// kernel: ff_forward.1
= control target key start
LH: loop header
LB: loop body
LE: loop exit
PB: predicated region body
PF: predicated region fallthrough
CT: control target
= control target key end

     0   :  { %s286_s1 = inlined_call_operand.vmem [shape: f32[128,128], index: 1, kind: input, shape index: {}]   ;;  %s287_s0 = inlined_call_operand.vmem [shape: f32[16,128], index: 0, kind: input, shape index: {}]   ;;  %s288_s2 = inlined_call_operand.vmem [shape: f32[1,128], index: 2, kind: input, shape index: {}]   ;;  %s289_s3 = inlined_call_operand.vmem [shape: f32[16,128], index: 3, kind: output, shape index: {}]  }
   0x1   :  { %v31_v0 = vld [vmem:[%s286_s1 + $0x78] sm:$0xff]  ;;  %v30_v1 = vld [vmem:[%s286_s1 + $0x70] sm:$0xff]  ;;  %v29_v2 = vld [vmem:[%s286_s1 + $0x68] sm:$0xff] }
   0x2   :  { %164 = vmatprep.subr.mxu0 %v31_v0  ;;  %v28_v3 = vld [vmem:[%s286_s1 + $0x60] sm:$0xff]  ;;  %v27_v5 = vld [vmem:[%s286_s1 + $0x58] sm:$0xff]  ;;  %v26_v6 = vld [vmem:[%s286_s1 + $0x50] sm:$0xff] }
   0x3   :  { %165 = vmatpush3.msra.mxu0 %v31_v0  ;;  %v14_v4 = vld [vmem:[%s287_s0] sm:$0xff]  ;;  %v25_v7 = vld [vmem:[%s286_s1 + $0x48] sm:$0xff]  ;;  %v23_v9 = vld [vmem:[%s286_s1 + $0x38] sm:$0xff] }
   0x4   :  { %166 = vmatprep.subr.mxu0 %v30_v1  ;;  %196 = vmatprep.mubr.f32.mxu0 %v14_v4  ;;  %v24_v8 = vld [vmem:[%s286_s1 + $0x40] sm:$0xff]  ;;  %v22_v10 = vld [vmem:[%s286_s1 + $0x30] sm:$0xff]  ;;  %v21_v11 = vld [vmem:[%s286_s1 + $0x28] sm:$0xff] }
   0x5   :  { %167 = vmatpush3.msra.mxu0 %v30_v1  ;;  %v20_v12 = vld [vmem:[%s286_s1 + $0x20] sm:$0xff]  ;;  %v19_v13 = vld [vmem:[%s286_s1 + $0x18] sm:$0xff]  ;;  %v18_v14 = vld [vmem:[%s286_s1 + $0x10] sm:$0xff] }
   0x6   :  { %168 = vmatprep.subr.mxu0 %v29_v2  ;;  %v17_v15 = vld [vmem:[%s286_s1 + $0x8] sm:$0xff]  ;;  %v16_v16 = vld [vmem:[%s286_s1] sm:$0xff] }
   0x7   :  { %169 = vmatpush3.msra.mxu0 %v29_v2  ;;  %v15_v17 = vld [vmem:[%s287_s0 + $0x8] sm:$0xff]  ;;  %v145_v18 = vld [vmem:[%s288_s2] ss:$0 sm:$0xff] }
   0x8   :  { %170 = vmatprep.subr.mxu0 %v28_v3 }
   0x9   :  { %171 = vmatpush3.msra.mxu0 %v28_v3 }
   0xa   :  { %172 = vmatprep.subr.mxu0 %v27_v5 }
   0xb   :  { %173 = vmatpush3.msra.mxu0 %v27_v5 }
   0xc   :  { %174 = vmatprep.subr.mxu0 %v26_v6 }
   0xd   :  { %175 = vmatpush3.msra.mxu0 %v26_v6 }
   0xe   :  { %176 = vmatprep.subr.mxu0 %v25_v7 }
   0xf   :  { %177 = vmatpush3.msra.mxu0 %v25_v7 }
  0x10   :  { %178 = vmatprep.subr.mxu0 %v24_v8 }
  0x11   :  { %179 = vmatpush3.msra.mxu0 %v24_v8 }
  0x12   :  { %180 = vmatprep.subr.mxu0 %v23_v9 }
  0x13   :  { %181 = vmatpush3.msra.mxu0 %v23_v9 }
  0x14   :  { %182 = vmatprep.subr.mxu0 %v22_v10 }
  0x15   :  { %183 = vmatpush3.msra.mxu0 %v22_v10 }
  0x16   :  { %184 = vmatprep.subr.mxu0 %v21_v11 }
  0x17   :  { %185 = vmatpush3.msra.mxu0 %v21_v11 }
  0x18   :  { %186 = vmatprep.subr.mxu0 %v20_v12 }
  0x19   :  { %187 = vmatpush3.msra.mxu0 %v20_v12 }
  0x1a   :  { %188 = vmatprep.subr.mxu0 %v19_v13 }
  0x1b   :  { %189 = vmatpush3.msra.mxu0 %v19_v13 }
  0x1c   :  { %190 = vmatprep.subr.mxu0 %v18_v14 }
  0x1d   :  { %191 = vmatpush3.msra.mxu0 %v18_v14 }
  0x1e   :  { %192 = vmatprep.subr.mxu0 %v17_v15 }
  0x1f   :  { %193 = vmatpush3.msra.mxu0 %v17_v15 }
  0x20   :  { %194 = vmatprep.subr.mxu0 %v16_v16 }
  0x21   :  { %195 = vmatpush3.msra.mxu0 %v16_v16 }
  0x22   :  { %197 = vmatmul.mubr.f32.vlgmr.msra.gmra.mxu0 %v15_v17 }
  0xe2   :  { %v198_v19 = vpop.f32.mrf.mxu0 }
  0xe3   :  { %v136_v20 = vadd.f32 %v198_v19, %v145_v18 }
  0xe4   :  { %v98_v21 = vpop.f32.mrf.mxu0 }
  0xe5   :  { %199 = vtanh.f32 %v136_v20  ;;  %v135_v22 = vadd.f32 %v145_v18, %v98_v21 }
  0xe7   :  { %201 = vtanh.f32 %v135_v22 }
  0xf2   :  { %v200_v23 = vpop.eup %199 }
  0xf3   :  { %140 = vst [vmem:[%s289_s3 + $0x8] sm:$0xff] %v200_v23 }
  0xf4   :  { %v202_v24 = vpop.eup %201 }
  0xf5   :  { %139 = vst [vmem:[%s289_s3] sm:$0xff] %v202_v24 }

</bundles_post_ra>
